<compile_context>
chip_gen: v7x
topology: tpu7x:2x2x1
jax: 0.10.0
libtpu: 0.0.40
codegen_flags: <defaults>
</compile_context>

<pallas_src>
import jax
import jax.numpy as jnp
from jax.experimental import pallas as pl
from jax.experimental.pallas import tpu as pltpu


def _fused_linear_kernel(x_ref, w_ref, b_ref, o_ref):
    # x_ref: (N, K), w_ref: (K, M), b_ref: (1, M), o_ref: (N, M)
    v1 = jnp.dot(x_ref[...], w_ref[...],
                 preferred_element_type=jnp.float32) + b_ref[...]     # Linear (MXU)
    v3 = jnp.maximum(v1, 0.0) + 3.0                                   # relu, +3 (VPU)
    # sigmoid(v3) = 1 / (1 + exp(-v3)); exp + approx rcp both hit the EUP slot.
    v4 = pl.reciprocal(1.0 + jnp.exp(-v3), approx=True)
    o_ref[...] = (6.0 * v4).astype(o_ref.dtype)                       # 6 * sigmoid


def linear_relu_sigmoid(x, w_t, b2):
    """x: (N, K) f32, w_t: (K, M) f32 (pre-transposed), b2: (1, M) f32 -> (N, M) f32."""
    N, _ = x.shape
    M = w_t.shape[1]
    return pl.pallas_call(
        _fused_linear_kernel,
        out_shape=jax.ShapeDtypeStruct((N, M), jnp.float32),
        in_specs=[
            pl.BlockSpec(memory_space=pltpu.MemorySpace.VMEM),
            pl.BlockSpec(memory_space=pltpu.MemorySpace.VMEM),
            pl.BlockSpec(memory_space=pltpu.MemorySpace.VMEM),
        ],
        out_specs=pl.BlockSpec(memory_space=pltpu.MemorySpace.VMEM),
    )(x, w_t, b2)


def prepare_params(w, b):
    """One-time parameter prep (hoisted out of the per-call path):
    w: (M, K) torch-Linear layout -> w_t: (K, M); b: (M,) -> (1, M)."""
    return jnp.asarray(w).T, jnp.asarray(b).reshape(1, -1)


def _reference(x, w_t, b2):
    v1 = x @ w_t + b2
    v2 = jnp.maximum(v1, 0.0)
    v3 = v2 + 3.0
    v4 = jax.nn.sigmoid(v3)
    return 6.0 * v4


if __name__ == "__main__":
    key = jax.random.PRNGKey(0)
    k_x, k_w, k_b = jax.random.split(key, 3)

    N, K, M = 8, 32, 16  # matches torch.nn.Linear(32, 16) with x1 = randn(8, 32)

    x = jax.random.normal(k_x, (N, K), dtype=jnp.float32)
    # Deterministic "Linear" params (mimics PyTorch's uniform(-1/sqrt(K), 1/sqrt(K)))
    bound = 1.0 / jnp.sqrt(jnp.float32(K))
    w = jax.random.uniform(k_w, (M, K), minval=-bound, maxval=bound, dtype=jnp.float32)
    b = jax.random.uniform(k_b, (M,), minval=-bound, maxval=bound, dtype=jnp.float32)

    # Parameter prep happens once, outside the jitted per-call path.
    w_t, b2 = prepare_params(w, b)

    fn = jax.jit(linear_relu_sigmoid)
    out = jax.block_until_ready(fn(x, w_t, b2))

    ref = _reference(x, w_t, b2)
    assert out.shape == (N, M)
    # Tolerance accounts for the approx EUP reciprocal in the sigmoid; any
    # semantic error (missing relu / +3 / 6x scale) is far outside 1e-2.
    assert jnp.allclose(out, ref, atol=1e-2, rtol=1e-2)

    print("KERNEL_OK")
</pallas_src>

<mosaic_0001>
module attributes {stable_mosaic.version = 11 : i64} {
  func.func @_fused_linear_kernel(%arg0: memref<8x32xf32, #tpu.memory_space<vmem>>, %arg1: memref<32x16xf32, #tpu.memory_space<vmem>>, %arg2: memref<1x16xf32, #tpu.memory_space<vmem>>, %arg3: memref<8x16xf32, #tpu.memory_space<vmem>>) attributes {dimension_semantics = [], scalar_prefetch = 0 : i64, scratch_operands = 0 : i64, tpu.core_type = #tpu.core_type<tc>} {
    %c0 = arith.constant 0 : index
    %c0_0 = arith.constant 0 : index
    %0 = vector.load %arg0[%c0, %c0_0] : memref<8x32xf32, #tpu.memory_space<vmem>>, vector<8x32xf32>
    %c0_1 = arith.constant 0 : index
    %c0_2 = arith.constant 0 : index
    %1 = vector.load %arg1[%c0_1, %c0_2] : memref<32x16xf32, #tpu.memory_space<vmem>>, vector<32x16xf32>
    %cst = arith.constant dense<0.000000e+00> : vector<8x16xf32>
    %2 = tpu.matmul %0, %1, %cst {dimension_numbers = #tpu.dot_dimension_numbers<[1], [0], [0], [1], [0, 0, 1, 1], [], []>} : vector<8x32xf32>, vector<32x16xf32>, vector<8x16xf32> -> vector<8x16xf32>
    %c0_3 = arith.constant 0 : index
    %c0_4 = arith.constant 0 : index
    %3 = vector.load %arg2[%c0_3, %c0_4] : memref<1x16xf32, #tpu.memory_space<vmem>>, vector<1x16xf32>
    %4 = vector.broadcast %3 : vector<1x16xf32> to vector<8x16xf32>
    %5 = arith.addf %2, %4 : vector<8x16xf32>
    %cst_5 = arith.constant 0.000000e+00 : f32
    %6 = vector.broadcast %cst_5 : f32 to vector<8x16xf32>
    %7 = arith.maximumf %5, %6 : vector<8x16xf32>
    %cst_6 = arith.constant 3.000000e+00 : f32
    %8 = vector.broadcast %cst_6 : f32 to vector<8x16xf32>
    %9 = arith.addf %7, %8 : vector<8x16xf32>
    %cst_7 = arith.constant 0.000000e+00 : f32
    %10 = vector.broadcast %cst_7 : f32 to vector<8x16xf32>
    %11 = arith.subf %10, %9 : vector<8x16xf32>
    %12 = math.exp %11 : vector<8x16xf32>
    %cst_8 = arith.constant 1.000000e+00 : f32
    %13 = vector.broadcast %cst_8 : f32 to vector<8x16xf32>
    %14 = arith.addf %13, %12 : vector<8x16xf32>
    %15 = tpu.reciprocal %14 {approx = true} : vector<8x16xf32> -> vector<8x16xf32>
    %cst_9 = arith.constant 6.000000e+00 : f32
    %16 = vector.broadcast %cst_9 : f32 to vector<8x16xf32>
    %17 = arith.mulf %16, %15 : vector<8x16xf32>
    %c0_10 = arith.constant 0 : index
    %c0_11 = arith.constant 0 : index
    %18 = vector.load %arg3[%c0_10, %c0_11] : memref<8x16xf32, #tpu.memory_space<vmem>>, vector<8x16xf32>
    tpu.vector_store %arg3[%c0_10, %c0_11], %17 {strides = array<i32>} : memref<8x16xf32, #tpu.memory_space<vmem>>, vector<8x16xf32>,
    return
  }
}

</mosaic_0001>

<bundles_post_ra>
// kernel: linear_relu_sigmoid.1
= control target key start
LH: loop header
LB: loop body
LE: loop exit
PB: predicated region body
PF: predicated region fallthrough
CT: control target
= control target key end

     0   :  { %v181_v3 = vmov 0.0|0.0   ;;  %vm182_vm0 = vmmov 0   ;;  %v183_v6 = vmov 0.0   ;;  %s235_s0 = inlined_call_operand.vmem [shape: f32[8,32], index: 0, kind: input, shape index: {}]   ;;  %s236_s1 = inlined_call_operand.vmem [shape: f32[32,16], index: 1, kind: input, shape index: {}]   ;;  %s237_s2 = inlined_call_operand.vmem [shape: f32[1,16], index: 2, kind: input, shape index: {}]   ;;  %s238_s3 = inlined_call_operand.hbm [shape: f32[8,16], index: 3, kind: output, shape index: {}]  }
   0x1   :  { %v16_v0 = vld [vmem:[%s236_s1] sm:$0xff]  ;;  %v17_v1 = vld [vmem:[%s236_s1 + $0x8] sm:$0xff]  ;;  %v18_v2 = vld [vmem:[%s236_s1 + $0x10] sm:$0xff]  ;;  %143 = vmatprep.subr.bf16.mxu0 %v181_v3  ;;  %140 = vmatprep.mubr.msk.f32.mxu0 %vm182_vm0, %v183_v6 }
   0x2   :  { %v144_v4 = vpack.c.bf16 %v17_v1, %v16_v0  ;;  %v19_v5 = vld [vmem:[%s236_s1 + $0x18] sm:$0xff] }
   0x3   :  { %8 = vsyncpa [#allocation3], 0  ;;  %v147_v7 = vpack.c.bf16 %v19_v5, %v18_v2  ;;  %v15_v8 = vld [vmem:[%s235_s0] sm:$0xff]  ;;  %vm27_vm1 = vcmask 261120   ;;  %s184_s1 = smov [#allocation2]   ;;  %vm109_vm2 = vcmask 130048  }
   0x4   :  { %145 = vmatpush3.bf16.msra.mxu0 %v144_v4  ;;  %v125_v9 = vld [vmem:[%s237_s2] ss:$0 sm:$0xff]  ;;  %s117_s24 = sshll.u32 %s184_s1, 4  ;;  %s118_s24 = int_to_ptr.vmem [resolvable:$true] %s117_s24 }
   0x5   :  { %146 = vmatprep.subr.bf16.mxu0 %v181_v3  ;;  %s157_s0 = scalar_lea.vmem %s118_s24, 128  ;;  %p162_p1 = scmp.lt.s32.totalorder %s118_s24, %s118_s24 }
   0x6   :  { %p158_p0 = scmp.ne.s32.totalorder %s118_s24, %s157_s0  ;;  %p163_p2 = scmp.lt.s32.totalorder %s157_s0, %s157_s0 }
   0x8   :  { %148 = vmatpush3.bf16.msra.mxu0 %v147_v7  ;;  %p164_p3 = por %p163_p2, %p162_p1 }
   0xa   :  { %p165_p4 = pnand %p164_p3, %p158_p0 }
   0xb   :  { %141 = vmatmul.mubr.msk.f32.vlgmr.msra.gmra.mrb[0].mxu0 %vm27_vm1, %v15_v8 }
  0xde   :  { %v97_v10 = vpop.f32.mrb[0].mxu0 }
  0xdf   :  { %v98_v11 = vadd.f32 %v125_v9, %v97_v10  ;;  %v142_v12 = vpop.f32.mrb[1].mxu0 }
  0xe1   :  { %v101_v13 = vmax.f32 %v98_v11, 0.0 }
  0xe3   :  { %v102_v14 = vadd.f32 3.0, %v101_v13 }
  0xe5   :  { %v103_v15 = vsub.f32 0.0, %v102_v14 }
  0xe7   :  { %v104_v16 = vmul.f32 1.442695, %v103_v15 }
  0xe9   :  { %153 = vpow2.f32 %v104_v16 }
  0xf3   :  { %v154_v17 = vpop.eup %153 }
  0xf4   :  { %v106_v18 = vadd.f32 1.0, %v154_v17 }
  0xf6   :  { %155 = vrcp.f32 %v106_v18 }
 0x100   :  { %v156_v19 = vpop.eup %155 }
 0x101   :  { %v108_v20 = vmul.f32 6.0, %v156_v19 }
 0x103   :  { %110 = vst.msk [vmem:[#allocation2] sm:$0xff] %vm109_vm2, %v108_v20 }
 0x104   :  { %168 = shalt.err (!%p165_p4)
}
 0x105   :  { %s169_s26 = scalar_lea.hbm %s238_s3, 128 }
 0x106   :  { %p170_p5 = scmp.ne.s32.totalorder %s238_s3, %s169_s26  ;;  %p173_p6 = scmp.lt.u32.totalorder %s169_s26, %s238_s3 }
 0x108   :  { %p175_p7 = pnand %p173_p6, %p170_p5 }
 0x10a   :  { %178 = shalt.err (!%p175_p7)
}
 0x10b   :  { %120 = dma.vmem_to_hbm [thread:$0]  %s118_s24, 128, %s238_s3, [#allocation3]  }
 0x10c   :  { %179 = dma.done.wait [#allocation3], 128  }
 0x10d   :  { %180 = vsyncadd [#allocation3], 4294967168 }
 0x10e   :  { %124 = vsyncpa [#allocation3], 1 }

</bundles_post_ra>
